<compile_context>
chip_gen: v5e
topology: v5e:2x2
jax: 0.10.0
libtpu: 0.0.40
codegen_flags: <defaults>
</compile_context>

<pallas_src>
import jax
import jax.numpy as jnp
from jax import lax
from jax.experimental import pallas as pl
from jax.experimental.pallas import tpu as pltpu


def _round_up(v, m):
    return (v + m - 1) // m * m


def _klinear_kernel(x_ref, c_ref, csq_ref, scale_ref, w_ref, b_ref, o_ref, xsq_ref):
    """One (n, o, m) grid step of the fused gaussian feature map + linear.

    x_ref    : (TN, D)   input tile (full D, unpadded)
    c_ref    : (TM, D)   centers tile (f32)
    csq_ref  : (1, TM)   precomputed ||c||^2
    scale_ref: (1, TM)   per-center -1 / (2 * sigma^2)   (0 for padded centers)
    w_ref    : (TO, TM)  weight tile, torch (O, M) layout (bf16 by default)
    b_ref    : (1, TO)   bias (sum of expert biases)
    o_ref    : (TN, TO)  f32 output tile; VMEM-resident accumulator across m
    xsq_ref  : (TN, 1)   f32 scratch holding ||x||^2 (computed once at m == 0)
    """
    m_step = pl.program_id(2)

    x = x_ref[...].astype(jnp.float32)                               # (TN, D)

    @pl.when(m_step == 0)
    def _init():
        # ||x||^2 is constant across the M reduction: compute it once per tile.
        xsq_ref[...] = jnp.sum(x * x, axis=-1, keepdims=True)        # (TN, 1)
        # Accumulate directly into the output block (its index is constant over m);
        # seed with the bias so no separate scratch / final copy / bias add is needed.
        o_ref[...] = jnp.broadcast_to(b_ref[...], o_ref.shape)

    # x @ c^T on the MXU, contracting the shared D axis (no transposes). Kept in f32:
    # the ||x||^2 + ||c||^2 - 2 x.c expansion is the precision-sensitive part.
    xc = lax.dot_general(x, c_ref[...], (((1,), (1,)), ((), ())),
                         preferred_element_type=jnp.float32)          # (TN, TM)

    # Gaussian kernel argument; per-center scale supports fused committees with
    # different sigmas. Clamp cancellation noise (d^2 < 0) so k <= 1.
    arg = (xsq_ref[...] + csq_ref[...] - 2.0 * xc) * scale_ref[...]   # (TN, TM)
    arg = jnp.minimum(arg, 0.0)
    # k in [0, 1]: cast to the weight dtype (bf16 default) -> native bf16 MXU path.
    k = jnp.exp(arg).astype(w_ref.dtype)

    # phi(x) @ W.T : contract k's M axis with the weight's native (O, M) layout,
    # accumulating in f32 directly into the resident output tile.
    o_ref[...] += lax.dot_general(k, w_ref[...], (((1,), (1,)), ((), ())),
                                  preferred_element_type=jnp.float32)  # (TN, TO)


def prepare_committee_params(experts, *, tile_m=512, tile_o=512,
                             weight_dtype=jnp.bfloat16):
    """One-time packing of one or more kLinear experts' static parameters.

    experts: list of (centers (M_e, D), weight (O, M_e), bias (O,) or None, sigma).
    Experts are fused by concatenating centers / weight columns along M and carrying
    a per-center scale -1/(2*sigma_e^2); the committee sum falls out of the existing
    M reduction. Call this once and reuse the result across forward calls.
    """
    if not experts:
        raise ValueError("The committee does not have any expert yet.")
    D = int(experts[0][0].shape[1])
    O = int(experts[0][1].shape[0])

    c_list, w_list, s_list = [], [], []
    b_sum = jnp.zeros((O,), jnp.float32)
    for centers, weight, bias, sigma in experts:
        centers = jnp.asarray(centers, jnp.float32)
        weight = jnp.asarray(weight, jnp.float32)
        if centers.shape[1] != D or weight.shape[0] != O:
            raise ValueError("All experts must share in_features and out_features.")
        m_e = centers.shape[0]
        c_list.append(centers)
        w_list.append(weight)
        s_list.append(jnp.full((m_e,), -1.0 / (2.0 * float(sigma) ** 2), jnp.float32))
        if bias is not None:
            b_sum = b_sum + jnp.asarray(bias, jnp.float32)

    c_cat = jnp.concatenate(c_list, axis=0)           # (M, D)
    w_cat = jnp.concatenate(w_list, axis=1)           # (O, M)
    s_cat = jnp.concatenate(s_list, axis=0)           # (M,)
    M = c_cat.shape[0]

    TM = min(int(tile_m), _round_up(M, 128))
    M_pad = _round_up(M, TM)
    TO = min(int(tile_o), _round_up(O, 128))
    O_pad = _round_up(O, TO)

    # Zero padding is exact: padded centers get zero scale (-> k = 1) and zero weight
    # columns (-> contribute 0); padded output rows are sliced off after the call.
    c_p = jnp.zeros((M_pad, D), jnp.float32).at[:M].set(c_cat)
    w_p = jnp.zeros((O_pad, M_pad), jnp.float32).at[:O, :M].set(w_cat).astype(weight_dtype)
    b_p = jnp.zeros((1, O_pad), jnp.float32).at[0, :O].set(b_sum)
    s_p = jnp.zeros((1, M_pad), jnp.float32).at[0, :M].set(s_cat)
    csq = jnp.sum(c_p * c_p, axis=-1)[None, :]        # (1, M_pad), ||c||^2 hoisted

    return dict(centers=c_p, csq=csq, scale=s_p, weight=w_p, bias=b_p,
                out_features=O, in_features=D, tile_m=TM, tile_o=TO)


def prepare_klinear_params(centers, weight, bias, sigma=1.0, *, tile_m=512,
                           tile_o=512, weight_dtype=jnp.bfloat16):
    return prepare_committee_params([(centers, weight, bias, sigma)],
                                    tile_m=tile_m, tile_o=tile_o,
                                    weight_dtype=weight_dtype)


def klinear_forward(params, x, *, tile_n=256):
    """kLinear / kLinearCommittee forward with packed params from prepare_*_params."""
    x = jnp.asarray(x)
    N, D = x.shape
    if D != params["in_features"]:
        raise ValueError("in_features mismatch.")
    c_p, csq, s_p, w_p, b_p = (params["centers"], params["csq"], params["scale"],
                               params["weight"], params["bias"])
    M_pad = c_p.shape[0]
    O_pad = w_p.shape[0]
    O = params["out_features"]
    TM = params["tile_m"]
    TO = params["tile_o"]
    TN = min(int(tile_n), _round_up(N, 8))

    # (N tiles, O tiles, M reduction) -- reduction axis last, N/O parallel.
    grid = (pl.cdiv(N, TN), O_pad // TO, M_pad // TM)

    # Explicit VMEM budget sized to the actual (double-buffered) tile set + headroom,
    # so larger tiles are not capped by the 16/32 MiB scoped defaults.
    w_bytes = jnp.dtype(w_p.dtype).itemsize
    vmem_est = 2 * (TN * D * 4 + TM * D * 4 + 2 * TM * 4 + TO * TM * w_bytes
                    + TO * 4 + TN * TO * 4) + TN * 4
    vmem_limit = int(min(100 * 2**20, 2 * vmem_est + 16 * 2**20))

    out = pl.pallas_call(
        _klinear_kernel,
        out_shape=jax.ShapeDtypeStruct((N, O_pad), jnp.float32),
        grid_spec=pltpu.PrefetchScalarGridSpec(
            num_scalar_prefetch=0,
            grid=grid,
            in_specs=[
                pl.BlockSpec((TN, D), lambda n, o, m: (n, 0)),    # x (full-D block)
                pl.BlockSpec((TM, D), lambda n, o, m: (m, 0)),    # centers (f32)
                pl.BlockSpec((1, TM), lambda n, o, m: (0, m)),    # ||c||^2
                pl.BlockSpec((1, TM), lambda n, o, m: (0, m)),    # -1/(2 sigma^2)
                pl.BlockSpec((TO, TM), lambda n, o, m: (o, m)),   # weight (O, M) layout
                pl.BlockSpec((1, TO), lambda n, o, m: (0, o)),    # bias
            ],
            out_specs=pl.BlockSpec((TN, TO), lambda n, o, m: (n, o)),
            scratch_shapes=[pltpu.VMEM((TN, 1), jnp.float32)],    # ||x||^2
        ),
        compiler_params=pltpu.CompilerParams(
            dimension_semantics=("parallel", "parallel", "arbitrary"),
            vmem_limit_bytes=vmem_limit),
    )(x, c_p, csq, s_p, w_p, b_p)

    return out if O == O_pad else out[:, :O]


def klinear_indirect_gaussian(x, centers, weight, bias, sigma=1.0, *,
                              tile_n=256, tile_m=512, tile_o=512,
                              weight_dtype=jnp.bfloat16):
    """Convenience one-shot kLinear(evaluation='indirect', kernel='gaussian') forward."""
    params = prepare_klinear_params(centers, weight, bias, sigma, tile_m=tile_m,
                                    tile_o=tile_o, weight_dtype=weight_dtype)
    return klinear_forward(params, x, tile_n=tile_n)


def klinear_committee_forward(x, experts, *, tile_n=256, tile_m=512, tile_o=512,
                              weight_dtype=jnp.bfloat16):
    """kLinearCommittee forward (sum of experts) as a single fused pallas_call."""
    params = prepare_committee_params(experts, tile_m=tile_m, tile_o=tile_o,
                                      weight_dtype=weight_dtype)
    return klinear_forward(params, x, tile_n=tile_n)


def _reference(x, centers, weight, bias, sigma=1.0):
    """Pure-JAX (f32) reference matching the PyTorch semantics."""
    d2 = jnp.sum((x[:, None, :] - centers[None, :, :]) ** 2, axis=-1)  # (N, M)
    k = jnp.exp(-d2 / (2.0 * sigma * sigma))
    return k @ weight.T + bias[None, :]


if __name__ == "__main__":
    # Small, deterministic synthetic setup. Shapes deliberately NOT tile-aligned
    # (N=20, O=160) to exercise partial-N blocks, O tiling and O padding/slicing.
    N, D, M, O = 20, 32, 256, 160
    sigma = 4.0

    key = jax.random.PRNGKey(0)
    kx, kc, kw, kb, kc2, kw2, kb2 = jax.random.split(key, 7)

    x = jax.random.normal(kx, (N, D), dtype=jnp.float32)
    centers = jax.random.normal(kc, (M, D), dtype=jnp.float32)
    bound = 1.0 / jnp.sqrt(jnp.float32(M))
    weight = jax.random.uniform(kw, (O, M), minval=-bound, maxval=bound,
                                dtype=jnp.float32)
    bias = jax.random.uniform(kb, (O,), minval=-bound, maxval=bound,
                              dtype=jnp.float32)

    # Small tiles -> grid is genuinely (3 N-tiles x 2 O-tiles x 2 M-steps): exercises
    # the bias init at m==0, in-place accumulation and masked partial-N writes.
    out = klinear_indirect_gaussian(x, centers, weight, bias, sigma=sigma,
                                    tile_n=8, tile_m=128, tile_o=128)
    out = jax.block_until_ready(out)

    ref = _reference(x, centers, weight, bias, sigma=sigma)
    assert out.shape == (N, O)
    # bf16 MXU operands for phi(x) @ W.T -> bf16-level tolerance vs the f32 reference.
    err = float(jnp.max(jnp.abs(out - ref)))
    assert jnp.allclose(out, ref, rtol=2e-2, atol=5e-3), f"max abs err {err}"

    # kLinearCommittee: two experts with different sigmas / center counts, fused into
    # ONE pallas_call (concatenated M axis + per-center scale, summed biases).
    centers2 = jax.random.normal(kc2, (M // 2, D), dtype=jnp.float32)
    bound2 = 1.0 / jnp.sqrt(jnp.float32(M // 2))
    weight2 = jax.random.uniform(kw2, (O, M // 2), minval=-bound2, maxval=bound2,
                                 dtype=jnp.float32)
    bias2 = jax.random.uniform(kb2, (O,), minval=-bound2, maxval=bound2,
                               dtype=jnp.float32)
    sigma2 = 2.0
    experts = [(centers, weight, bias, sigma), (centers2, weight2, bias2, sigma2)]
    out_c = jax.block_until_ready(
        klinear_committee_forward(x, experts, tile_n=8, tile_m=128, tile_o=128))
    ref_c = (_reference(x, centers, weight, bias, sigma=sigma)
             + _reference(x, centers2, weight2, bias2, sigma=sigma2))
    err_c = float(jnp.max(jnp.abs(out_c - ref_c)))
    assert out_c.shape == (N, O)
    assert jnp.allclose(out_c, ref_c, rtol=2e-2, atol=5e-3), (
        f"committee max abs err {err_c}")

    # TODO(synk): 'direct' evaluation of the gaussian kernel has no finite feature
    # map (and other kernels from Phi are not covered), so only the 'indirect'
    # gaussian path is implemented here.
    print("KERNEL_OK")
</pallas_src>

<mosaic_0001>
module attributes {stable_mosaic.version = 11 : i64} {
  func.func @_klinear_kernel(%arg0: i32, %arg1: i32, %arg2: i32, %arg3: memref<8x32xf32, #tpu.memory_space<vmem>>, %arg4: memref<128x32xf32, #tpu.memory_space<vmem>>, %arg5: memref<1x128xf32, #tpu.memory_space<vmem>>, %arg6: memref<1x128xf32, #tpu.memory_space<vmem>>, %arg7: memref<128x128xbf16, #tpu.memory_space<vmem>>, %arg8: memref<1x128xf32, #tpu.memory_space<vmem>>, %arg9: memref<8x128xf32, #tpu.memory_space<vmem>>, %arg10: memref<8x1xf32, #tpu.memory_space<vmem>>) attributes {dimension_semantics = [#tpu.dimension_semantics<parallel>, #tpu.dimension_semantics<parallel>, #tpu.dimension_semantics<arbitrary>], iteration_bounds = array<i64: 3, 2, 2>, scalar_prefetch = 0 : i64, scratch_operands = 1 : i64, tpu.core_type = #tpu.core_type<tc>, window_params = [{transform_indices = @transform_0, window_bounds = array<i64: 8, 32>}, {transform_indices = @transform_1, window_bounds = array<i64: 128, 32>}, {transform_indices = @transform_2, window_bounds = array<i64: 1, 128>}, {transform_indices = @transform_3, window_bounds = array<i64: 1, 128>}, {transform_indices = @transform_4, window_bounds = array<i64: 128, 128>}, {transform_indices = @transform_5, window_bounds = array<i64: 1, 128>}, {transform_indices = @transform_6, window_bounds = array<i64: 8, 128>}]} {
    %c0 = arith.constant 0 : index
    %c0_0 = arith.constant 0 : index
    %0 = vector.load %arg3[%c0, %c0_0] : memref<8x32xf32, #tpu.memory_space<vmem>>, vector<8x32xf32>
    %c0_i32 = arith.constant 0 : i32
    %1 = arith.cmpi eq, %arg2, %c0_i32 : i32
    %2 = arith.extui %1 : i1 to i32
    %c0_i32_1 = arith.constant 0 : i32
    %3 = arith.cmpi ne, %2, %c0_i32_1 : i32
    scf.if %3 {
      %26 = arith.mulf %0, %0 : vector<8x32xf32>
      %cst_19 = arith.constant dense<0.000000e+00> : vector<8xf32>
      %27 = vector.multi_reduction <add>, %26, %cst_19 [1] : vector<8x32xf32> to vector<8xf32>
      %28 = vector.shape_cast %27 : vector<8xf32> to vector<8x1xf32>
      %c0_20 = arith.constant 0 : index
      %c0_21 = arith.constant 0 : index
      %29 = vector.load %arg10[%c0_20, %c0_21] : memref<8x1xf32, #tpu.memory_space<vmem>>, vector<8x1xf32>
      tpu.vector_store %arg10[%c0_20, %c0_21], %28 {strides = array<i32>} : memref<8x1xf32, #tpu.memory_space<vmem>>, vector<8x1xf32>,
      %c0_22 = arith.constant 0 : index
      %c0_23 = arith.constant 0 : index
      %30 = vector.load %arg8[%c0_22, %c0_23] : memref<1x128xf32, #tpu.memory_space<vmem>>, vector<1x128xf32>
      %31 = vector.shape_cast %30 : vector<1x128xf32> to vector<1x128xf32>
      %32 = vector.broadcast %31 : vector<1x128xf32> to vector<8x128xf32>
      %c0_24 = arith.constant 0 : index
      %c0_25 = arith.constant 0 : index
      %33 = vector.load %arg9[%c0_24, %c0_25] : memref<8x128xf32, #tpu.memory_space<vmem>>, vector<8x128xf32>
      tpu.vector_store %arg9[%c0_24, %c0_25], %32 {strides = array<i32>} : memref<8x128xf32, #tpu.memory_space<vmem>>, vector<8x128xf32>,
    } else {
    }
    %c0_2 = arith.constant 0 : index
    %c0_3 = arith.constant 0 : index
    %4 = vector.load %arg4[%c0_2, %c0_3] : memref<128x32xf32, #tpu.memory_space<vmem>>, vector<128x32xf32>
    %cst = arith.constant dense<0.000000e+00> : vector<8x128xf32>
    %5 = tpu.matmul %0, %4, %cst {dimension_numbers = #tpu.dot_dimension_numbers<[1], [1], [0], [0], [0, 0, 1, 0], [], []>} : vector<8x32xf32>, vector<128x32xf32>, vector<8x128xf32> -> vector<8x128xf32>
    %c0_4 = arith.constant 0 : index
    %c0_5 = arith.constant 0 : index
    %6 = vector.load %arg10[%c0_4, %c0_5] : memref<8x1xf32, #tpu.memory_space<vmem>>, vector<8x1xf32>
    %c0_6 = arith.constant 0 : index
    %c0_7 = arith.constant 0 : index
    %7 = vector.load %arg5[%c0_6, %c0_7] : memref<1x128xf32, #tpu.memory_space<vmem>>, vector<1x128xf32>
    %8 = vector.broadcast %6 : vector<8x1xf32> to vector<8x128xf32>
    %9 = vector.broadcast %7 : vector<1x128xf32> to vector<8x128xf32>
    %10 = arith.addf %8, %9 : vector<8x128xf32>
    %cst_8 = arith.constant 2.000000e+00 : f32
    %11 = vector.broadcast %cst_8 : f32 to vector<8x128xf32>
    %12 = arith.mulf %11, %5 : vector<8x128xf32>
    %13 = arith.subf %10, %12 : vector<8x128xf32>
    %c0_9 = arith.constant 0 : index
    %c0_10 = arith.constant 0 : index
    %14 = vector.load %arg6[%c0_9, %c0_10] : memref<1x128xf32, #tpu.memory_space<vmem>>, vector<1x128xf32>
    %15 = vector.broadcast %14 : vector<1x128xf32> to vector<8x128xf32>
    %16 = arith.mulf %13, %15 : vector<8x128xf32>
    %cst_11 = arith.constant 0.000000e+00 : f32
    %17 = vector.broadcast %cst_11 : f32 to vector<8x128xf32>
    %18 = arith.minimumf %16, %17 : vector<8x128xf32>
    %19 = math.exp %18 : vector<8x128xf32>
    %20 = arith.truncf %19 : vector<8x128xf32> to vector<8x128xbf16>
    %c0_12 = arith.constant 0 : index
    %c0_13 = arith.constant 0 : index
    %21 = vector.load %arg9[%c0_12, %c0_13] : memref<8x128xf32, #tpu.memory_space<vmem>>, vector<8x128xf32>
    %c0_14 = arith.constant 0 : index
    %c0_15 = arith.constant 0 : index
    %22 = vector.load %arg7[%c0_14, %c0_15] : memref<128x128xbf16, #tpu.memory_space<vmem>>, vector<128x128xbf16>
    %cst_16 = arith.constant dense<0.000000e+00> : vector<8x128xf32>
    %23 = tpu.matmul %20, %22, %cst_16 {dimension_numbers = #tpu.dot_dimension_numbers<[1], [1], [0], [0], [0, 0, 1, 0], [], []>} : vector<8x128xbf16>, vector<128x128xbf16>, vector<8x128xf32> -> vector<8x128xf32>
    %24 = arith.addf %21, %23 : vector<8x128xf32>
    %c0_17 = arith.constant 0 : index
    %c0_18 = arith.constant 0 : index
    %25 = vector.load %arg9[%c0_17, %c0_18] : memref<8x128xf32, #tpu.memory_space<vmem>>, vector<8x128xf32>
    tpu.vector_store %arg9[%c0_17, %c0_18], %24 {strides = array<i32>} : memref<8x128xf32, #tpu.memory_space<vmem>>, vector<8x128xf32>,
    return
  }
  func.func @transform_0(%arg0: i32, %arg1: i32, %arg2: i32) -> (i32, i32) {
    %c0_i32 = arith.constant 0 : i32
    %c0_i32_0 = arith.constant 0 : i32
    return %arg0, %c0_i32 : i32, i32
  }
  func.func @transform_1(%arg0: i32, %arg1: i32, %arg2: i32) -> (i32, i32) {
    %c0_i32 = arith.constant 0 : i32
    %c0_i32_0 = arith.constant 0 : i32
    return %arg2, %c0_i32 : i32, i32
  }
  func.func @transform_2(%arg0: i32, %arg1: i32, %arg2: i32) -> (i32, i32) {
    %c0_i32 = arith.constant 0 : i32
    %c0_i32_0 = arith.constant 0 : i32
    return %c0_i32, %arg2 : i32, i32
  }
  func.func @transform_3(%arg0: i32, %arg1: i32, %arg2: i32) -> (i32, i32) {
    %c0_i32 = arith.constant 0 : i32
    %c0_i32_0 = arith.constant 0 : i32
    return %c0_i32, %arg2 : i32, i32
  }
  func.func @transform_4(%arg0: i32, %arg1: i32, %arg2: i32) -> (i32, i32) {
    %c0_i32 = arith.constant 0 : i32
    return %arg1, %arg2 : i32, i32
  }
  func.func @transform_5(%arg0: i32, %arg1: i32, %arg2: i32) -> (i32, i32) {
    %c0_i32 = arith.constant 0 : i32
    %c0_i32_0 = arith.constant 0 : i32
    return %c0_i32, %arg1 : i32, i32
  }
  func.func @transform_6(%arg0: i32, %arg1: i32, %arg2: i32) -> (i32, i32) {
    %c0_i32 = arith.constant 0 : i32
    return %arg0, %arg1 : i32, i32
  }
}

</mosaic_0001>

<bundles_post_ra>
// kernel: tpu_custom_call.1
= control target key start
LH: loop header
LB: loop body
LE: loop exit
PB: predicated region body
PF: predicated region fallthrough
CT: control target
= control target key end

     0   :  { %s1464_s0 = inlined_call_operand.vmem [shape: f32[20,32], index: 0, kind: input, shape index: {}]   ;;  %s1465_s1 = inlined_call_operand.vmem [shape: f32[256,32], index: 1, kind: input, shape index: {}]   ;;  %s1466_s2 = inlined_call_operand.vmem [shape: f32[1,256], index: 2, kind: input, shape index: {}]   ;;  %s1467_s3 = inlined_call_operand.vmem [shape: f32[1,256], index: 3, kind: input, shape index: {}]   ;;  %s1468_s4 = inlined_call_operand.vmem [shape: bf16[256,256], index: 4, kind: input, shape index: {}]   ;;  %s1469_s5 = inlined_call_operand.vmem [shape: f32[1,256], index: 5, kind: input, shape index: {}]   ;;  %s1470_s6 = inlined_call_operand.hbm [shape: f32[20,256], index: 6, kind: output, shape index: {}]  }
   0x1   :  { %1480 = sst [smem:[#allocation15_spill]] %s1468_s4 }
   0x2   :  { %1481 = sst [smem:[#allocation16_spill]] %s1469_s5 }
   0x3   :  { %1482 = sst [smem:[#allocation17_spill]] %s1470_s6 }
   0x4   :  { %11 = vsyncpa [#allocation5], 0 }
   0x5   :  { %13 = vsyncpa [#allocation5 + $0x1], 0  ;;  %s1175_s21 = smov 0   ;;  %s1177_s22 = smov 0  }
   0x6   :  { %s1179_s23 = smov 0   ;;  %s1181_s24 = smov 0  }
   0x7   :  { %s1183_s25 = smov 0   ;;  %s1185_s26 = smov 0  }
   0x8   :  { %s1187_s27 = smov 0   ;;  %s1189_s28 = smov 0  }
   0x9   :  { %s1191_s29 = smov 0   ;;  %s1193_s30 = smov 0  }
   0xa   :  { %s1195_s7 = smov 0   ;;  %s1197_s8 = smov 0  }
   0xb LB: > { %1483 = sst [smem:[#allocation7_spill]] %s1109_s25  ;;  %s823_s9 = sadd.s32 4294967295, %s1137_s8   ;;  %s1137_s8 = sphi %s1197_s8, %s19_s8   ;;  %s1133_s7 = sphi %s1195_s7, %s1505_s7   ;;  %s1129_s30 = sphi %s1193_s30, %s1504_s30   ;;  %s1125_s29 = sphi %s1191_s29, %s1503_s29   ;;  %s1121_s28 = sphi %s1189_s28, %s1502_s28   ;;  %s1117_s27 = sphi %s1187_s27, %s1501_s27   ;;  %s1113_s26 = sphi %s1185_s26, %s1500_s26   ;;  %s1109_s25 = sphi %s1183_s25, %s1499_s25   ;;  %s1105_s24 = sphi %s1181_s24, %s1498_s24   ;;  %s1101_s23 = sphi %s1179_s23, %s1508_s23   ;;  %s1097_s22 = sphi %s1177_s22, %s1507_s22   ;;  %s1093_s21 = sphi %s1175_s21, %s1506_s21  }
   0xc   : > { %1484 = sst [smem:[#allocation8_spill]] %s1125_s29  ;;  %s824_s10 = sadd.s32 4294967294, %s1137_s8  }
   0xd   : > { %1485 = sst [smem:[#allocation9_spill]] %s1129_s30  ;;  %s31_s11 = sadd.s32 1, %s1125_s29 }
   0xe   : > { %1486 = sst [smem:[#allocation10_spill]] %s1133_s7  ;;  %s34_s12 = sadd.s32 1, %s1129_s30 }
   0xf   : > { %p32_p0 = scmp.ge.s32.totalorder %s31_s11, 2  ;;  %s38_s13 = sadd.s32 1, %s1133_s7 }
  0x10   : > { %s151_s14 = sadd.s32 1, %s1109_s25  ;;  %p158_p1 = scmp.ne.s32.totalorder %s1109_s25, %s1105_s24 }
  0x11   : > { %s1510_s11 = smov (%p32_p0, %s31_s11), 0  ;;  %s1512_s12 = smov (!%p32_p0, %s34_s12), %s1129_s30 }
  0x12   : > { %1487 = sst [smem:[#allocation11_spill]] %s1510_s11  ;;  %s147_s15 = ssub.s32 %s1125_s29, %s1510_s11 }
  0x13   : > { %p159_p2 = scmp.eq.s32.totalorder %s1137_s8, 0  ;;  %p36_p3 = scmp.ge.s32.totalorder %s1512_s12, 2 }
  0x14   : > { %s205_s16 = sadd.s32 1, %s1101_s23  ;;  %p215_p5 = scmp.ne.s32.totalorder %s1101_s23, %s1097_s22 }
  0x15   : > { %p1250_p4 = por %p159_p2, %p158_p1  ;;  %s1514_s12 = smov (%p36_p3, %s1512_s12), 0 }
  0x16   : > { %1489 = sst [smem:[#allocation12_spill]] %s1514_s12  ;;  %s1516_s13 = smov (!%p36_p3, %s38_s13), %s1133_s7 }
  0x17   : > { %s146_s18 = ssub.s32 %s1129_s30, %s1514_s12  ;;  %p216_p6 = scmp.eq.s32.totalorder %s823_s9, 11 }
  0x18   : > { %p40_p7 = scmp.ge.s32.totalorder %s1516_s13, 3  ;;  %s148_s19 = sor.u32 %s147_s15, %s146_s18 }
  0x19   : > { %p149_p8 = scmp.eq.s32.totalorder %s148_s19, 0  ;;  %p1261_p9 = por %p216_p6, %p215_p5 }
  0x1a   : > { %s1518_s13 = smov (%p40_p7, %s1516_s13), 0  ;;  %p221_p10 = scmp.ne.s32.totalorder %s1097_s22, %s1093_s21 }
  0x1b   : > { %1491 = sst [smem:[#allocation13_spill]] %s1518_s13  ;;  %s200_s6 = ssub.s32 %s1133_s7, %s1518_s13 }
  0x1c   : > { %s1268_s11 = scalar_select %p149_p8, %s1109_s25, %s151_s14  }
  0x1d   : > { %s202_s5 = sor.u32 %s200_s6, %s146_s18  ;;  %p222_p11 = scmp.eq.s32.totalorder %s824_s10, 11 }
  0x1e   : > { %1492 = sst [smem:[#allocation14_spill]] %s1268_s11  ;;  %p203_p12 = scmp.eq.s32.totalorder %s202_s5, 0 }
  0x1f   : > { %p1274_p13 = por %p222_p11, %p221_p10  ;;  %p826_p0 = scmp.ge.s32.totalorder %s1137_s8, 12 }
  0x20   : > { %s1279_s9 = scalar_select %p203_p12, %s1101_s23, %s205_s16  }
  0x21   : > { %238 = sbr.rel (%p826_p0) target bundleno = 64 (0x40), region = 16 }
  0x26   : > { %269 = sbr.rel (!%p1250_p4) target bundleno = 64 (0x40), region = 36  ;;  %s271_s14 = sand.u32 (%p1250_p4), 1, %s1109_s25  }
  0x27   : > { %s892_s15 = sshll.u32 (%p1250_p4), %s1129_s30, 5  ;;  %s827_s6 = sshll.u32 (%p1250_p4), %s271_s14, 6 }
  0x28   : > { %s276_s10 = sadd.s32 (%p1250_p4), %s1125_s29, %s892_s15  ;;  %s1494_s4 = sld [smem:[#allocation15_spill]] (%p1250_p4) }
  0x29   : > { %s830_s5 = sshll.u32 (%p1250_p4), %s276_s10, 2  ;;  %s273_s16 = scalar_lea.vmem (%p1250_p4), [#allocation3], %s827_s6 }
  0x2e   : > { %s1290_s13 = scalar_lea.vmem %s1494_s4, %s830_s5 }
  0x2f   : > { %v295_v0 = vld [vmem:[%s1290_s13] sm:$0xf]  ;;  %v297_v1 = vld [vmem:[%s1290_s13 + $0x8] sm:$0xf]  ;;  %v299_v2 = vld [vmem:[%s1290_s13 + $0x10] sm:$0xf] }
  0x30   : > { %296 = vst [vmem:[%s273_s16] sm:$0xf] %v295_v0  ;;  %v301_v3 = vld [vmem:[%s1290_s13 + $0x18] sm:$0xf]  ;;  %v303_v4 = vld [vmem:[%s1290_s13 + $0x20] sm:$0xf] }
  0x31   : > { %298 = vst [vmem:[%s273_s16 + $0x4] sm:$0xf] %v297_v1  ;;  %v305_v5 = vld [vmem:[%s1290_s13 + $0x28] sm:$0xf]  ;;  %v307_v6 = vld [vmem:[%s1290_s13 + $0x30] sm:$0xf] }
  0x32   : > { %300 = vst [vmem:[%s273_s16 + $0x8] sm:$0xf] %v299_v2  ;;  %v309_v7 = vld [vmem:[%s1290_s13 + $0x38] sm:$0xf]  ;;  %v311_v8 = vld [vmem:[%s1290_s13 + $0x40] sm:$0xf] }
  0x33   : > { %302 = vst [vmem:[%s273_s16 + $0xc] sm:$0xf] %v301_v3  ;;  %v313_v9 = vld [vmem:[%s1290_s13 + $0x48] sm:$0xf]  ;;  %v315_v10 = vld [vmem:[%s1290_s13 + $0x50] sm:$0xf] }
  0x34   : > { %304 = vst [vmem:[%s273_s16 + $0x10] sm:$0xf] %v303_v4  ;;  %v317_v11 = vld [vmem:[%s1290_s13 + $0x58] sm:$0xf]  ;;  %v319_v12 = vld [vmem:[%s1290_s13 + $0x60] sm:$0xf] }
  0x35   : > { %306 = vst [vmem:[%s273_s16 + $0x14] sm:$0xf] %v305_v5  ;;  %v321_v13 = vld [vmem:[%s1290_s13 + $0x68] sm:$0xf]  ;;  %v323_v14 = vld [vmem:[%s1290_s13 + $0x70] sm:$0xf] }
  0x36   : > { %308 = vst [vmem:[%s273_s16 + $0x18] sm:$0xf] %v307_v6  ;;  %v325_v15 = vld [vmem:[%s1290_s13 + $0x78] sm:$0xf] }
  0x37   : > { %310 = vst [vmem:[%s273_s16 + $0x1c] sm:$0xf] %v309_v7 }
  0x38   : > { %312 = vst [vmem:[%s273_s16 + $0x20] sm:$0xf] %v311_v8 }
  0x39   : > { %314 = vst [vmem:[%s273_s16 + $0x24] sm:$0xf] %v313_v9 }
  0x3a   : > { %316 = vst [vmem:[%s273_s16 + $0x28] sm:$0xf] %v315_v10 }
  0x3b   : > { %318 = vst [vmem:[%s273_s16 + $0x2c] sm:$0xf] %v317_v11 }
  0x3c   : > { %320 = vst [vmem:[%s273_s16 + $0x30] sm:$0xf] %v319_v12 }
  0x3d   : > { %322 = vst [vmem:[%s273_s16 + $0x34] sm:$0xf] %v321_v13 }
  0x3e   : > { %324 = vst [vmem:[%s273_s16 + $0x38] sm:$0xf] %v323_v14 }
  0x3f   : > { %326 = vst [vmem:[%s273_s16 + $0x3c] sm:$0xf] %v325_v15 }
  0x40 PF: > { %p831_p1 = scmp.ge.s32.totalorder %s1137_s8, 1  ;;  %p387_p2 = scmp.lt.s32.totalorder %s1137_s8, 13 }
  0x42   : > { %p388_p3 = pnand %p831_p1, %p387_p2 }
  0x43   : > { %s394_s13 = sand.u32 (!%p388_p3), 1, %s1105_s24   ;;  %s1477_s17 = sand.u32 (!%p388_p3), 1, %s1097_s22  }
  0x44   : > { %391 = sbr.rel (%p388_p3) target bundleno = 549 (0x225), region = 81  ;;  %s832_s14 = sshll.u32 (!%p388_p3), %s394_s13, 6 }
  0x45   : > { %s833_s15 = sshll.u32 (!%p388_p3), %s1477_s17, 3  ;;  %p441_p4 = scmp.lt.s32.totalorder (!%p388_p3), %s1121_s28, 2 }
  0x46   : > { %s835_s6 = sshll.u32 (!%p388_p3), %s1113_s26, 4  ;;  %p451_p6 = scmp.lt.s32.totalorder (!%p388_p3), %s1113_s26, 1 }
  0x47   : > { %p446_p5 = scmp.lt.s32.totalorder (!%p388_p3), %s835_s6, 31  ;;  %p458_p7 = scmp.lt.s32.totalorder (!%p388_p3), %s1117_s27, 1 }
  0x48   : > { %s1495_s7 = sld [smem:[#allocation16_spill]] (!%p388_p3)  ;;  %s1344_s24 = scalar_lea.vmem (!%p388_p3), [#allocation3], %s832_s14 }
  0x49   : > { %s442_s10 = scalar_select %p441_p4, %s1121_s28, 2 }
  0x4a   : > { %s1520_s6 = smov (!%p446_p5, %s835_s6), 31  ;;  %p837_p8 = scmp.ne.s32.totalorder %s1113_s26, 0 }
  0x4b   : > { %s834_s5 = sshll.u32 %s442_s10, 3  ;;  %s836_s4 = sshll.u32 %s1520_s6, 3 }
  0x4c   : > { %s444_s16 = scalar_lea.vmem %s1464_s0, %s834_s5  ;;  %s1325_s30 = scalar_lea.vmem %s1465_s1, %s836_s4 }
  0x4d   : > { %v1327_v16 = vld [vmem:[%s444_s16] sm:$0xff]  ;;  %s1330_s13 = scalar_select %p451_p6, %s1113_s26, 1 }
  0x4e   : > { %s459_s17 = scalar_select %p458_p7, %s1117_s27, 1 }
  0x4f   : > { %s453_s11 = scalar_lea.vmem %s1466_s2, %s1330_s13  ;;  %s456_s6 = scalar_lea.vmem %s1467_s3, %s1330_s13 }
  0x50   : > { %s460_s4 = scalar_lea.vmem %s1495_s7, %s459_s17  ;;  %s1346_s16 = scalar_lea.vmem [#allocation4], %s833_s15 }
  0x51   : > { %465 = sbr.rel (%p837_p8) target bundleno = 206 (0xce), region = 89 }
  0x56   : > { %v466_v17 = vmul.f32 %v1327_v16, %v1327_v16  ;;  %vm467_vm0 = vcmask 261120   ;;  %v1005_v19 = vld [vmem:[%s460_s4] ss:$0 sm:$0xff]  ;;  %vm471_vm1 = vcmask 7168  }
  0x57   : > { %477 = vst [vmem:[%s1346_s16] sm:$0xff] %v1005_v19 }
  0x58   : > { %v468_v18 = vsel %vm467_vm0, %v466_v17, 0.0 }
  0x59   : > { %469 = vadd.xlane.f32.xlu0 %v468_v18 }
  0xcc   : > { %v470_v20 = vpop.xlane.xlu0 %469 }
  0xcd   : > { %472 = vst.msk [vmem:[#allocation2] sm:$0xff] %vm471_vm1, %v470_v20 }
  0xce PF: > { %v493_v21 = vld [vmem:[%s1325_s30 + $0x78] sm:$0xff]  ;;  %vm494_vm2 = vcmask 261120   ;;  %v492_v22 = vld [vmem:[%s1325_s30 + $0x70] sm:$0xff]  ;;  %v491_v23 = vld [vmem:[%s1325_s30 + $0x68] sm:$0xff]  ;;  %v1139_v32 = vmov 0   ;;  %s1496_s18 = sld [smem:[#allocation17_spill]] }
  0xcf   : > { %838 = vmatpush.xpose.msk.msra.mxu0 %vm494_vm2, %v493_v21  ;;  %v490_v24 = vld [vmem:[%s1325_s30 + $0x60] sm:$0xff]  ;;  %v489_v25 = vld [vmem:[%s1325_s30 + $0x58] sm:$0xff]  ;;  %v488_v26 = vld [vmem:[%s1325_s30 + $0x50] sm:$0xff]  ;;  %1006 = vset.pattern.permute.xlu0 %v1139_v32  ;;  %s683_s13 = sshll.u32 %s1346_s16, 4  ;;  %s1497_s19 = sand.u32 1, %s1097_s22   ;;  %s684_s13 = int_to_ptr.vmem [resolvable:$true] %s683_s13 }
  0xd0   : > { %v487_v27 = vld [vmem:[%s1325_s30 + $0x48] sm:$0xff]  ;;  %v486_v28 = vld [vmem:[%s1325_s30 + $0x40] sm:$0xff]  ;;  %v485_v29 = vld [vmem:[%s1325_s30 + $0x38] sm:$0xff]  ;;  %s669_s7 = scalar_lea.sflag [#allocation5], %s1497_s19 }
  0xd1   : > { %v900_v31 = vld [vmem:[%s1344_s24 + $0x38] sm:$0xff]  ;;  %v484_v33 = vld [vmem:[%s1325_s30 + $0x30] sm:$0xff]  ;;  %v483_v34 = vld [vmem:[%s1325_s30 + $0x28] sm:$0xff] }
  0xd2   : > { %653 = vmatpush.bf16.xpose.msra.mxu1 %v900_v31  ;;  %v899_v35 = vld [vmem:[%s1344_s24 + $0x30] sm:$0xff]  ;;  %v482_v36 = vld [vmem:[%s1325_s30 + $0x20] sm:$0xff]  ;;  %v898_v38 = vld [vmem:[%s1344_s24 + $0x28] sm:$0xff] }
  0xd3   : > { %839 = vmatpush.xpose.msk.msra.mxu0 %vm494_vm2, %v492_v22  ;;  %v481_v37 = vld [vmem:[%s1325_s30 + $0x18] sm:$0xff]  ;;  %v480_v39 = vld [vmem:[%s1325_s30 + $0x10] sm:$0xff]  ;;  %v479_v40 = vld [vmem:[%s1325_s30 + $0x8] sm:$0xff] }
  0xd4   : > { %v566_v30 = vld [vmem:[#allocation2] sm:$0xff]  ;;  %v897_v41 = vld [vmem:[%s1344_s24 + $0x20] sm:$0xff]  ;;  %v895_v44 = vld [vmem:[%s1344_s24 + $0x10] sm:$0xff]  ;;  %s1031_s25 = scalar_lea.hbm %s1496_s18, 48 }
  0xd5   : > { %570 = vperm.xlu0 %1006, %v566_v30   ;;  %v478_v42 = vld [vmem:[%s1325_s30] sm:$0xff]  ;;  %v894_v45 = vld [vmem:[%s1344_s24 + $0x8] sm:$0xff]  ;;  %v893_v46 = vld [vmem:[%s1344_s24] sm:$0xff] }
  0xd6   : > { %v896_v43 = vld [vmem:[%s1344_s24 + $0x18] sm:$0xff]  ;;  %v588_v59 = vld [vmem:[%s1346_s16] sm:$0xff] }
  0xd7   : > { %840 = vmatpush.xpose.msk.msra.mxu0 %vm494_vm2, %v491_v23  ;;  %v1007_v47 = vld [vmem:[%s453_s11] ss:$0 sm:$0xff]  ;;  %s888_s11 = sshll.u32 %s1121_s28, 1 }
  0xd8   : > { %v1008_v52 = vld [vmem:[%s456_s6] ss:$0 sm:$0xff]  ;;  %s679_s17 = sadd.s32 %s1117_s27, %s888_s11 }
  0xd9   : > { %s889_s14 = sshll.u32 %s679_s17, 3 }
  0xda   : > { %654 = vmatpush.bf16.xpose.msra.mxu1 %v899_v35  ;;  %s681_s5 = scalar_lea.hbm %s1496_s18, %s889_s14 }
  0xdb   : > { %841 = vmatpush.xpose.msk.msra.mxu0 %vm494_vm2, %v490_v24  ;;  %s685_s6 = sshll.u32 %s681_s5, 4  ;;  %s686_s6 = int_to_ptr.hbm [resolvable:$true] %s685_s6 }
  0xdc   : > { %s1025_s4 = sshra.s32 %s686_s6, 4  ;;  %s1026_s4 = int_to_ptr.hbm [resolvable:$true] %s1025_s4 }
  0xdd   : > { %s1027_s28 = scalar_lea.hbm %s1026_s4, 8  ;;  %p1032_p0 = scmp.lt.s32.totalorder %s1026_s4, %s1496_s18 }
  0xde   : > { %p1028_p10 = scmp.ne.s32.totalorder %s1026_s4, %s1027_s28  ;;  %p1033_p1 = scmp.lt.s32.totalorder %s1031_s25, %s1027_s28 }
  0xdf   : > { %842 = vmatpush.xpose.msk.msra.mxu0 %vm494_vm2, %v489_v25 }
  0xe0   : > { %p1029_p11 = pnand %p1028_p10, %p1261_p9  ;;  %p1034_p2 = por %p1033_p1, %p1032_p0 }
  0xe2   : > { %655 = vmatpush.bf16.xpose.msra.mxu1 %v898_v38  ;;  %p1030_p12 = pneg %p1029_p11 }
  0xe3   : > { %843 = vmatpush.xpose.msk.msra.mxu0 %vm494_vm2, %v488_v26 }
  0xe4   : > { %p1035_p3 = pnand %p1034_p2, %p1030_p12 }
  0xe7   : > { %844 = vmatpush.xpose.msk.msra.mxu0 %vm494_vm2, %v487_v27 }
  0xea   : > { %656 = vmatpush.bf16.xpose.msra.mxu1 %v897_v41 }
  0xeb   : > { %845 = vmatpush.xpose.msk.msra.mxu0 %vm494_vm2, %v486_v28 }
  0xef   : > { %846 = vmatpush.xpose.msk.msra.mxu0 %vm494_vm2, %v485_v29 }
  0xf2   : > { %657 = vmatpush.bf16.xpose.msra.mxu1 %v896_v43 }
  0xf3   : > { %847 = vmatpush.xpose.msk.msra.mxu0 %vm494_vm2, %v484_v33 }
  0xf7   : > { %848 = vmatpush.xpose.msk.msra.mxu0 %vm494_vm2, %v483_v34 }
  0xfa   : > { %658 = vmatpush.bf16.xpose.msra.mxu1 %v895_v44 }
  0xfb   : > { %849 = vmatpush.xpose.msk.msra.mxu0 %vm494_vm2, %v482_v36 }
  0xff   : > { %850 = vmatpush.xpose.msk.msra.mxu0 %vm494_vm2, %v481_v37 }
 0x102   : > { %659 = vmatpush.bf16.xpose.msra.mxu1 %v894_v45 }
 0x103   : > { %851 = vmatpush.xpose.msk.msra.mxu0 %vm494_vm2, %v480_v39 }
 0x107   : > { %852 = vmatpush.xpose.msk.msra.mxu0 %vm494_vm2, %v479_v40 }
 0x10a   : > { %660 = vmatpush.bf16.xpose.msra.mxu1 %v893_v46 }
 0x10b   : > { %853 = vmatpush.xpose.msk.msra.mxu0 %vm494_vm2, %v478_v42 }
 0x10e   : > { %854 = vmatmul.msk.f32.vlgmr.msra.gmra.mxu0 %vm494_vm2, %v1327_v16 }
 0x147   : > { %v571_v48 = vpop.permute.xlu0 %570 }
 0x148   : > { %v576_v49 = vadd.f32 %v1007_v47, %v571_v48 }
 0x18b   : > { %v563_v50 = vpop.f32.mrf.mxu0 }
 0x18c   : > { %v577_v51 = vmul.f32 2.0, %v563_v50 }
 0x18e   : > { %v578_v53 = vsub.f32 %v576_v49, %v577_v51 }
 0x190   : > { %v583_v54 = vmul.f32 %v1008_v52, %v578_v53 }
 0x192   : > { %v584_v55 = vmin.f32 %v583_v54, 0.0 }
 0x194   : > { %v585_v56 = vmul.f32 1.442695, %v584_v55 }
 0x196   : > { %1009 = vpow2.f32 %v585_v56 }
 0x19c   : > { %v1010_v57 = vpop.eup %1009 }
 0x19d   : > { %v587_v58 = vpack.c.bf16 %v1010_v57, %v1010_v57 }
 0x19f   : > { %661 = vmatmul.bf16.vlgmr.msra.gmra.mxu1 %v587_v58 }
 0x21c   : > { %v662_v60 = vpop.f32.mrf.mxu1 }
 0x21d   : > { %v666_v61 = vadd.f32 %v662_v60, %v588_v59 }
 0x21f   : > { %667 = vst [vmem:[%s1346_s16] sm:$0xff] %v666_v61 }
 0x220   : > { %1038 = shalt.err (!%p1035_p3)
}
 0x221   : > { %901 = dma.vmem_to_hbm [thread:$0]  (%p1261_p9), %s684_s13, 128, %s686_s6, %s669_s7  }
 0x224   : > { %v664_v62 = vpop.f32.mrf.mxu1 }
 0x225 PF: > { %p907_p4 = scmp.ge.s32.totalorder %s1137_s8, 2  ;;  %s697_s16 = sand.u32 1, %s1093_s21  }
 0x226   : > { %s698_s30 = scalar_lea.sflag [#allocation5], %s697_s16 }
 0x227   : > { %p904_p5 = pnand %p907_p4, %p1274_p13 }
 0x229   : > { %p905_p6 = pneg %p904_p5 }
 0x22b   : > { %1088 = dma.done.wait (%p905_p6), %s698_s30, 128  }
 0x22c   : > { %1090 = vsyncadd (%p905_p6), %s698_s30, 4294967168  ;;  %s19_s8 = sadd.s32 1, %s1137_s8   ;;  %s1498_s24 = sld [smem:[#allocation7_spill]] }
 0x22d   : > { %p16_p7 = scmp.ge.s32.totalorder %s19_s8, 14   ;;  %s1499_s25 = sld [smem:[#allocation14_spill]] }
 0x22e   : > { %s1500_s26 = sld [smem:[#allocation8_spill]]  ;;  %s1506_s21 = smov %s1097_s22 }
 0x22f   : > { %s1501_s27 = sld [smem:[#allocation9_spill]]  ;;  %s1507_s22 = smov %s1101_s23 }
 0x230   : > { %s1502_s28 = sld [smem:[#allocation10_spill]]  ;;  %s1508_s23 = smov %s1279_s9 }
 0x231   : > { %s1503_s29 = sld [smem:[#allocation11_spill]]  ;;  %18 = sbr.rel (!%p16_p7) target bundleno = 11 (0xb), region = 144 }
 0x232   : > { %s1504_s30 = sld [smem:[#allocation12_spill]] }
 0x233   : > { %s1505_s7 = sld [smem:[#allocation13_spill]] }
 0x236   :  { %704 = vsyncpa [#allocation5], 1 }
 0x237   :  { %706 = vsyncpa [#allocation5 + $0x1], 1 }

</bundles_post_ra>
